<compile_context>
chip_gen: v7x
topology: tpu7x:2x2x1
jax: 0.10.0
libtpu: 0.0.40
codegen_flags: <defaults>
</compile_context>

<pallas_src>
import jax
import jax.numpy as jnp
from jax import lax
from jax.experimental import pallas as pl
from jax.experimental.pallas import tpu as pltpu

_INV_SQRT2 = 0.7071067811865476


def _round_up(x, m):
    return (x + m - 1) // m * m


def _sublane(dtype):
    return {1: 32, 2: 16, 4: 8}.get(jnp.dtype(dtype).itemsize, 8)


def _vmem_capacity_bytes():
    try:
        return int(pltpu.get_tpu_info().vmem_capacity_bytes)
    except Exception:
        return 64 << 20  # conservative fallback: v7x per-TensorCore VMEM


def _make_kernel(compute_dtype, approximate_gelu):
    def kernel(x_ref, w_ref, b_ref, o_ref):
        # x_ref: (tm, H) input dtype  w_ref: (H, tn) bf16  b_ref: (1, tn) f32
        # Cast the activation tile in-kernel (VPU cast co-issues with MXU).
        x = x_ref[...].astype(compute_dtype)
        acc = jnp.dot(x, w_ref[...], preferred_element_type=jnp.float32)
        acc = acc + b_ref[...]                       # broadcast bias over rows
        if approximate_gelu:
            # tanh-approx GELU: transcendental moves to the EUP slot.
            act = jax.nn.gelu(acc, approximate=True)
        else:
            # exact erf GELU: matches PyTorch BertIntermediate numerics.
            act = acc * 0.5 * (1.0 + lax.erf(acc * _INV_SQRT2))
        o_ref[...] = act.astype(o_ref.dtype)
    return kernel


def bert_intermediate(hidden_states, weight, bias, *, tm=None, tn=None,
                      compute_dtype=jnp.bfloat16, out_dtype=None,
                      approximate_gelu=False):
    """gelu(hidden_states @ weight + bias).

    hidden_states: [B, S, H]
    weight:        [H, I]   (transposed vs. torch Linear's [I, H])
    bias:          [I]
    returns:       [B, S, I] in out_dtype (defaults to hidden_states.dtype)
    """
    B, S, H = hidden_states.shape
    H2, I = weight.shape
    assert H == H2
    out_dtype = hidden_states.dtype if out_dtype is None else out_dtype
    M = B * S

    x_dtype = hidden_states.dtype
    xbytes = jnp.dtype(x_dtype).itemsize
    cbytes = jnp.dtype(compute_dtype).itemsize
    obytes = jnp.dtype(out_dtype).itemsize

    vmem_cap = _vmem_capacity_bytes()
    budget = max(vmem_cap - (12 << 20), 16 << 20)        # leave compiler headroom
    tm_cap = 1024 if vmem_cap >= (96 << 20) else 512     # 128 MiB parts vs v7x

    sub = max(_sublane(x_dtype), _sublane(out_dtype))

    Ip = _round_up(I, 128)

    # N tiling: hold the full padded weight VMEM-resident when it fits
    # comfortably; it is then fetched once and never re-streamed.
    if tn is None:
        tn = Ip if H * Ip * cbytes <= budget // 3 else min(Ip, 2048)
    tn = min(_round_up(tn, 128), Ip)
    Ip = _round_up(Ip, tn)

    # M tiling: as large as fits, but keep >=2 parallel M steps so both
    # v7x TensorCores get work.
    if tm is None:
        tm = min(tm_cap, _round_up(M, sub))
        if M > sub and pl.cdiv(M, tm) < 2:
            tm = _round_up(pl.cdiv(M, 2), sub)
    tm = max(sub, _round_up(tm, sub))

    def footprint(tm_, w_bufs):
        return (2 * tm_ * H * xbytes            # double-buffered X tile
                + w_bufs * H * tn * cbytes      # weight block(s)
                + w_bufs * 8 * tn * 4           # bias block(s), sublane-padded
                + 2 * tm_ * tn * obytes)        # double-buffered output tile

    while tm > sub and footprint(tm, 2) > budget:
        tm = max(sub, _round_up(tm // 2, sub))

    gm = pl.cdiv(M, tm)
    gn = Ip // tn

    # Padding only touches W / bias (one-time, tiny).  X is passed through
    # untouched; the ragged last M tile is a partial block on a cdiv grid.
    x2d = hidden_states.reshape(M, H)
    w = weight.astype(compute_dtype)
    b2d = bias.astype(jnp.float32).reshape(1, I)
    if Ip != I:
        w = jnp.pad(w, ((0, 0), (0, Ip - I)))
        b2d = jnp.pad(b2d, ((0, 0), (0, Ip - I)))

    if gn == 1:
        # Whole weight resident: 1-D grid over M, both steps fully parallel.
        grid = (gm,)
        x_map = lambda i: (i, 0)
        w_map = lambda i: (0, 0)
        b_map = lambda i: (0, 0)
        o_map = lambda i: (i, 0)
        dims = ("parallel",)
        w_resident = True
    elif tn >= tm:
        # Re-stream traffic: gn*X_bytes vs gm*W_bytes  <=>  1/tn vs 1/tm.
        # tn >= tm -> keep the W tile resident across the inner M sweep and
        # re-stream X once per N tile (the cheaper order).
        grid = (gn, gm)
        x_map = lambda j, i: (i, 0)
        w_map = lambda j, i: (0, j)
        b_map = lambda j, i: (0, j)
        o_map = lambda j, i: (i, j)
        dims = ("parallel", "parallel")
        w_resident = False
    else:
        # tm > tn -> keep the X tile resident, re-stream W once per M tile.
        grid = (gm, gn)
        x_map = lambda i, j: (i, 0)
        w_map = lambda i, j: (0, j)
        b_map = lambda i, j: (0, j)
        o_map = lambda i, j: (i, j)
        dims = ("parallel", "parallel")
        w_resident = False

    cost = pl.CostEstimate(
        flops=2 * M * H * I,
        transcendentals=M * I,
        bytes_accessed=M * H * xbytes + H * I * cbytes + I * 4 + M * I * obytes,
    )

    kernel = _make_kernel(compute_dtype, approximate_gelu)

    def build(single_buffer_resident):
        w_bufs = 1 if single_buffer_resident else 2
        vmem_limit = int(min(budget, footprint(tm, w_bufs) + (4 << 20)))
        vmem_limit = max(vmem_limit, 8 << 20)
        if single_buffer_resident:
            # W / bias block index never changes: no need to double-allocate.
            w_spec = pl.BlockSpec((H, tn), w_map,
                                  pipeline_mode=pl.Buffered(buffer_count=1))
            b_spec = pl.BlockSpec((1, tn), b_map,
                                  pipeline_mode=pl.Buffered(buffer_count=1))
        else:
            w_spec = pl.BlockSpec((H, tn), w_map)
            b_spec = pl.BlockSpec((1, tn), b_map)
        return pl.pallas_call(
            kernel,
            out_shape=jax.ShapeDtypeStruct((M, Ip), out_dtype),
            grid_spec=pltpu.PrefetchScalarGridSpec(
                num_scalar_prefetch=0,
                grid=grid,
                in_specs=[pl.BlockSpec((tm, H), x_map), w_spec, b_spec],
                out_specs=pl.BlockSpec((tm, tn), o_map),
            ),
            compiler_params=pltpu.CompilerParams(
                dimension_semantics=dims,
                vmem_limit_bytes=vmem_limit,
            ),
            cost_estimate=cost,
        )

    if w_resident and hasattr(pl, "Buffered"):
        try:
            out2d = build(True)(x2d, w, b2d)
        except Exception:
            # Fallback for jax versions that reject single-buffered blocks.
            out2d = build(False)(x2d, w, b2d)
    else:
        out2d = build(False)(x2d, w, b2d)

    if Ip != I:
        out2d = out2d[:, :I]
    return out2d.reshape(B, S, I)


if __name__ == "__main__":
    # Config: hidden_size=32, intermediate_size=128, batch=2, seq=8
    B, S, H, I = 2, 8, 32, 128

    key = jax.random.PRNGKey(0)
    k_x, k_w, k_b = jax.random.split(key, 3)

    hidden_states = jax.random.normal(k_x, (B, S, H), dtype=jnp.float32)
    # Deterministic init of nn.Linear(H, I) parameters (stored as [H, I]).
    weight = jax.random.normal(k_w, (H, I), dtype=jnp.float32) * 0.02
    bias = jax.random.normal(k_b, (I,), dtype=jnp.float32) * 0.02

    out = bert_intermediate(hidden_states, weight, bias)
    out = jax.block_until_ready(out)
    assert out.shape == (B, S, I)

    def gelu_erf(x):
        return x * 0.5 * (1.0 + lax.erf(x * _INV_SQRT2))

    # Reference using the same bf16-operand / f32-accumulate math as the kernel.
    xb = hidden_states.reshape(B * S, H).astype(jnp.bfloat16)
    wb = weight.astype(jnp.bfloat16)
    ref = gelu_erf(
        jnp.dot(xb, wb, preferred_element_type=jnp.float32) + bias
    ).reshape(B, S, I)
    assert jnp.allclose(out, ref, atol=1e-4, rtol=1e-4), float(
        jnp.max(jnp.abs(out - ref)))

    # Sanity check against the pure-f32 reference at bf16-level tolerance.
    ref_f32 = gelu_erf(jnp.einsum("bsh,hi->bsi", hidden_states, weight) + bias)
    assert jnp.allclose(out, ref_f32, atol=5e-2, rtol=5e-2)

    print("KERNEL_OK")
</pallas_src>

<mosaic_0001>
module attributes {stable_mosaic.version = 11 : i64} {
  func.func @kernel(%arg0: i32, %arg1: memref<8x32xf32, #tpu.memory_space<vmem>>, %arg2: memref<32x128xbf16, #tpu.memory_space<vmem>>, %arg3: memref<1x128xf32, #tpu.memory_space<vmem>>, %arg4: memref<8x128xf32, #tpu.memory_space<vmem>>) attributes {dimension_semantics = [#tpu.dimension_semantics<parallel>], iteration_bounds = array<i64: 2>, scalar_prefetch = 0 : i64, scratch_operands = 0 : i64, tpu.core_type = #tpu.core_type<tc>, window_params = [{transform_indices = @transform_0, window_bounds = array<i64: 8, 32>}, {pipeline_mode = #tpu.pipeline_mode<synchronous>, transform_indices = @transform_1, window_bounds = array<i64: 32, 128>}, {pipeline_mode = #tpu.pipeline_mode<synchronous>, transform_indices = @transform_2, window_bounds = array<i64: 1, 128>}, {transform_indices = @transform_3, window_bounds = array<i64: 8, 128>}]} {
    %c0 = arith.constant 0 : index
    %c0_0 = arith.constant 0 : index
    %0 = vector.load %arg1[%c0, %c0_0] : memref<8x32xf32, #tpu.memory_space<vmem>>, vector<8x32xf32>
    %1 = arith.truncf %0 : vector<8x32xf32> to vector<8x32xbf16>
    %c0_1 = arith.constant 0 : index
    %c0_2 = arith.constant 0 : index
    %2 = vector.load %arg2[%c0_1, %c0_2] : memref<32x128xbf16, #tpu.memory_space<vmem>>, vector<32x128xbf16>
    %cst = arith.constant dense<0.000000e+00> : vector<8x128xf32>
    %3 = tpu.matmul %1, %2, %cst {dimension_numbers = #tpu.dot_dimension_numbers<[1], [0], [0], [1], [0, 0, 1, 1], [], []>} : vector<8x32xbf16>, vector<32x128xbf16>, vector<8x128xf32> -> vector<8x128xf32>
    %c0_3 = arith.constant 0 : index
    %c0_4 = arith.constant 0 : index
    %4 = vector.load %arg3[%c0_3, %c0_4] : memref<1x128xf32, #tpu.memory_space<vmem>>, vector<1x128xf32>
    %5 = vector.broadcast %4 : vector<1x128xf32> to vector<8x128xf32>
    %6 = arith.addf %3, %5 : vector<8x128xf32>
    %cst_5 = arith.constant 5.000000e-01 : f32
    %7 = vector.broadcast %cst_5 : f32 to vector<8x128xf32>
    %8 = arith.mulf %6, %7 : vector<8x128xf32>
    %cst_6 = arith.constant 0.707106769 : f32
    %9 = vector.broadcast %cst_6 : f32 to vector<8x128xf32>
    %10 = arith.mulf %6, %9 : vector<8x128xf32>
    %11 = math.erf %10 : vector<8x128xf32>
    %cst_7 = arith.constant 1.000000e+00 : f32
    %12 = vector.broadcast %cst_7 : f32 to vector<8x128xf32>
    %13 = arith.addf %12, %11 : vector<8x128xf32>
    %14 = arith.mulf %8, %13 : vector<8x128xf32>
    %c0_8 = arith.constant 0 : index
    %c0_9 = arith.constant 0 : index
    %15 = vector.load %arg4[%c0_8, %c0_9] : memref<8x128xf32, #tpu.memory_space<vmem>>, vector<8x128xf32>
    tpu.vector_store %arg4[%c0_8, %c0_9], %14 {strides = array<i32>} : memref<8x128xf32, #tpu.memory_space<vmem>>, vector<8x128xf32>,
    return
  }
  func.func @transform_0(%arg0: i32) -> (i32, i32) {
    %c0_i32 = arith.constant 0 : i32
    %c0_i32_0 = arith.constant 0 : i32
    return %arg0, %c0_i32 : i32, i32
  }
  func.func @transform_1(%arg0: i32) -> (i32, i32) {
    %c0_i32 = arith.constant 0 : i32
    %c0_i32_0 = arith.constant 0 : i32
    %c0_i32_1 = arith.constant 0 : i32
    return %c0_i32, %c0_i32_0 : i32, i32
  }
  func.func @transform_2(%arg0: i32) -> (i32, i32) {
    %c0_i32 = arith.constant 0 : i32
    %c0_i32_0 = arith.constant 0 : i32
    %c0_i32_1 = arith.constant 0 : i32
    return %c0_i32, %c0_i32_0 : i32, i32
  }
  func.func @transform_3(%arg0: i32) -> (i32, i32) {
    %c0_i32 = arith.constant 0 : i32
    %c0_i32_0 = arith.constant 0 : i32
    return %arg0, %c0_i32 : i32, i32
  }
}

module attributes {stable_mosaic.version = 11 : i64} {
  func.func @kernel(%arg0: i32, %arg1: memref<8x32xf32, #tpu.memory_space<vmem>>, %arg2: memref<32x128xbf16, #tpu.memory_space<vmem>>, %arg3: memref<1x128xf32, #tpu.memory_space<vmem>>, %arg4: memref<8x128xf32, #tpu.memory_space<vmem>>) attributes {dimension_semantics = [#tpu.dimension_semantics<parallel>], iteration_bounds = array<i64: 2>, scalar_prefetch = 0 : i64, scratch_operands = 0 : i64, tpu.core_type = #tpu.core_type<tc>, window_params = [{transform_indices = @transform_0, window_bounds = array<i64: 8, 32>}, {pipeline_mode = #tpu.pipeline_mode<synchronous>, transform_indices = @transform_1, window_bounds = array<i64: 32, 128>}, {pipeline_mode = #tpu.pipeline_mode<synchronous>, transform_indices = @transform_2, window_bounds = array<i64: 1, 128>}, {transform_indices = @transform_3, window_bounds = array<i64: 8, 128>}]} {
    %c0 = arith.constant 0 : index
    %c0_0 = arith.constant 0 : index
    %0 = vector.load %arg1[%c0, %c0_0] : memref<8x32xf32, #tpu.memory_space<vmem>>, vector<8x32xf32>
    %1 = arith.truncf %0 : vector<8x32xf32> to vector<8x32xbf16>
    %c0_1 = arith.constant 0 : index
    %c0_2 = arith.constant 0 : index
    %2 = vector.load %arg2[%c0_1, %c0_2] : memref<32x128xbf16, #tpu.memory_space<vmem>>, vector<32x128xbf16>
    %cst = arith.constant dense<0.000000e+00> : vector<8x128xf32>
    %3 = tpu.matmul %1, %2, %cst {dimension_numbers = #tpu.dot_dimension_numbers<[1], [0], [0], [1], [0, 0, 1, 1], [], []>} : vector<8x32xbf16>, vector<32x128xbf16>, vector<8x128xf32> -> vector<8x128xf32>
    %c0_3 = arith.constant 0 : index
    %c0_4 = arith.constant 0 : index
    %4 = vector.load %arg3[%c0_3, %c0_4] : memref<1x128xf32, #tpu.memory_space<vmem>>, vector<1x128xf32>
    %5 = vector.broadcast %4 : vector<1x128xf32> to vector<8x128xf32>
    %6 = arith.addf %3, %5 : vector<8x128xf32>
    %cst_5 = arith.constant 5.000000e-01 : f32
    %7 = vector.broadcast %cst_5 : f32 to vector<8x128xf32>
    %8 = arith.mulf %6, %7 : vector<8x128xf32>
    %cst_6 = arith.constant 0.707106769 : f32
    %9 = vector.broadcast %cst_6 : f32 to vector<8x128xf32>
    %10 = arith.mulf %6, %9 : vector<8x128xf32>
    %11 = math.erf %10 : vector<8x128xf32>
    %cst_7 = arith.constant 1.000000e+00 : f32
    %12 = vector.broadcast %cst_7 : f32 to vector<8x128xf32>
    %13 = arith.addf %12, %11 : vector<8x128xf32>
    %14 = arith.mulf %8, %13 : vector<8x128xf32>
    %c0_8 = arith.constant 0 : index
    %c0_9 = arith.constant 0 : index
    %15 = vector.load %arg4[%c0_8, %c0_9] : memref<8x128xf32, #tpu.memory_space<vmem>>, vector<8x128xf32>
    tpu.vector_store %arg4[%c0_8, %c0_9], %14 {strides = array<i32>} : memref<8x128xf32, #tpu.memory_space<vmem>>, vector<8x128xf32>,
    return
  }
  func.func @transform_0(%arg0: i32) -> (i32, i32) {
    %c0_i32 = arith.constant 0 : i32
    %c0_i32_0 = arith.constant 0 : i32
    return %arg0, %c0_i32 : i32, i32
  }
  func.func @transform_1(%arg0: i32) -> (i32, i32) {
    %c0_i32 = arith.constant 0 : i32
    %c0_i32_0 = arith.constant 0 : i32
    %c0_i32_1 = arith.constant 0 : i32
    return %c0_i32, %c0_i32_0 : i32, i32
  }
  func.func @transform_2(%arg0: i32) -> (i32, i32) {
    %c0_i32 = arith.constant 0 : i32
    %c0_i32_0 = arith.constant 0 : i32
    %c0_i32_1 = arith.constant 0 : i32
    return %c0_i32, %c0_i32_0 : i32, i32
  }
  func.func @transform_3(%arg0: i32) -> (i32, i32) {
    %c0_i32 = arith.constant 0 : i32
    %c0_i32_0 = arith.constant 0 : i32
    return %arg0, %c0_i32 : i32, i32
  }
}

</mosaic_0001>

<bundles_post_ra>
// kernel: tpu_custom_call.1
= control target key start
LH: loop header
LB: loop body
LE: loop exit
PB: predicated region body
PF: predicated region fallthrough
CT: control target
= control target key end

     0   :  { %8 = vsyncpa [#allocation3], 0  ;;  %s825_s0 = inlined_call_operand.hbm [shape: f32[16,32], index: 0, kind: input, shape index: {}]   ;;  %s826_s1 = inlined_call_operand.hbm [shape: bf16[32,128], index: 1, kind: input, shape index: {}]   ;;  %s827_s2 = inlined_call_operand.vmem [shape: f32[1,128], index: 2, kind: input, shape index: {}]   ;;  %s828_s3 = inlined_call_operand.hbm [shape: f32[16,128], index: 3, kind: output, shape index: {}]  }
   0x1   :  { %10 = vsyncpa [#allocation3 + $0x1], 0 }
   0x2   :  { %11 = vsyncpa [#allocation6], 0 }
   0x3   :  { %12 = vsyncpa [#allocation4], 0 }
   0x4   :  { %14 = vsyncpa [#allocation4 + $0x1], 0  ;;  %s622_s12 = smov 0   ;;  %s624_s13 = smov 0  }
   0x5   :  { %s626_s14 = smov 0   ;;  %s628_s15 = smov 0  }
   0x6 LB: > { %s643_s16 = sadd.s32 4294967295, %s593_s15   ;;  %s371_s17 = sadd.s32 4294967294, %s593_s15   ;;  %s593_s15 = sphi %s628_s15, %s848_s15   ;;  %s589_s14 = sphi %s626_s14, %s847_s14   ;;  %s585_s13 = sphi %s624_s13, %s846_s13   ;;  %s581_s12 = sphi %s622_s12, %s845_s12  }
   0x7   : > { %p40_p0 = scmp.ne.s32.totalorder %s585_s13, %s581_s12  ;;  %p829_p1 = scmp.eq.s32.totalorder %s643_s16, 0 }
   0x8   : > { %p112_p3 = scmp.eq.s32.totalorder %s371_s17, 1  ;;  %p372_p5 = scmp.ge.s32.totalorder %s593_s15, 1 }
   0x9   : > { %p652_p4 = por %p829_p1, %p40_p0  ;;  %p119_p7 = scmp.lt.s32.totalorder %s593_s15, 3 }
   0xa   : > { %p657_p6 = por %p112_p3, %p40_p0  ;;  %s595_s21 = smov [#allocation5]  }
   0xb   : > { %s832_s18 = scalar_select %p652_p4, 1, 0 }
   0xc   : > { %s833_s19 = scalar_select %p657_p6, 1, 0 }
   0xd   : > { %p662_p8 = pnand %p372_p5, %p119_p7  ;;  %s131_s22 = sshll.u32 %s595_s21, 4  ;;  %s666_s22 = int_to_ptr.vmem [resolvable:$true] %s131_s22 }
   0xe   : > { %s678_s24 = sadd.s32 1, %s593_s15   ;;  %s27_s25 = sadd.s32 1, %s589_s14 }
   0xf   : > { %s834_s20 = scalar_select %p662_p8, 1, 0 }
  0x10   : > { %p408_p9 = pneg %p662_p8  ;;  %s24_s26 = ssub.s32 %s593_s15, %s678_s24 }
  0x11   : > { %s465_s29 = scalar_lea.hbm %s826_s1, 256 }
  0x12   : > { %p673_p11 = pnand %p408_p9, %p829_p1  ;;  %p466_p12 = scmp.ne.s32.totalorder %s826_s1, %s465_s29 }
  0x13   : > { %p472_p5 = scmp.lt.u32.totalorder %s465_s29, %s826_s1 }
  0x14   : > { %p467_p13 = pneg %p673_p11 }
  0x16   : > { %p468_p0 = pnand %p467_p13, %p466_p12 }
  0x18   : > { %p469_p3 = pneg %p468_p0 }
  0x1a   : > { %p474_p7 = pnand %p472_p5, %p469_p3 }
  0x1c   : > { %477 = shalt.err (!%p474_p7)
}
  0x1d   : > { %s478_s7 = scalar_lea.vmem %s666_s22, 256  ;;  %p486_p2 = scmp.lt.s32.totalorder %s666_s22, %s666_s22 }
  0x1e   : > { %p479_p9 = scmp.ne.s32.totalorder %s666_s22, %s478_s7  ;;  %p487_p6 = scmp.lt.s32.totalorder %s478_s7, %s478_s7 }
  0x20   : > { %p481_p10 = pnand %p479_p9, %p467_p13  ;;  %p488_p4 = por %p487_p6, %p486_p2 }
  0x22   : > { %p482_p1 = pneg %p481_p10 }
  0x24   : > { %p489_p8 = pnand %p488_p4, %p482_p1 }
  0x26   : > { %492 = shalt.err (!%p489_p8)
}
  0x27   : > { %s596_s8 = smov 64   ;;  %s597_s9 = smov 4  }
  0x28   : > { %411 = dma.hbm_to_vmem [thread:$0]  (!%p673_p11), %s826_s1, 256, %s666_s22, [#allocation6], %s596_s8, %s596_s8, %s597_s9  }
  0x29   : > { %p25_p2 = scmp.eq.s32.totalorder %s24_s26, 0  ;;  %p34_p1 = scmp.ne.s32.totalorder %s589_s14, %s585_s13 }
  0x2a   : > { %p35_p4 = scmp.eq.s32.totalorder %s593_s15, 0  ;;  %p421_p6 = scmp.lt.s32.totalorder %s593_s15, 2 }
  0x2b   : > { %s709_s17 = scalar_select %p25_p2, %s589_s14, %s27_s25  }
  0x2c   : > { %p36_p8 = por %p35_p4, %p34_p1  ;;  %p836_p10 = scmp.eq.s32.totalorder %s643_s16, 1 }
  0x2d   : > { %s148_s27 = sand.u32 1, %s589_s14   ;;  %s376_s28 = sshll.u32 %s593_s15, 7 }
  0x2e   : > { %p713_p12 = por %p836_p10, %p34_p1  ;;  %s375_s29 = sshll.u32 %s148_s27, 3 }
  0x2f   : > { %s722_s4 = scalar_lea.hbm %s825_s0, %s376_s28  ;;  %s152_s22 = scalar_lea.vmem [#allocation2], %s375_s29 }
  0x30   : > { %s159_s25 = sshll.u32 %s152_s22, 4  ;;  %p724_p11 = pnand %p421_p6, %p36_p8  ;;  %s728_s25 = int_to_ptr.vmem [resolvable:$true] %s159_s25 }
  0x31   : > { %s149_s5 = scalar_lea.sflag [#allocation3], %s148_s27  ;;  %s493_s6 = scalar_lea.hbm %s722_s4, 128 }
  0x32   : > { %p494_p13 = scmp.ne.s32.totalorder %s722_s4, %s493_s6  ;;  %p495_p0 = pneg %p724_p11 }
  0x33   : > { %s498_s9 = scalar_lea.hbm %s825_s0, 256  ;;  %p499_p7 = scmp.lt.u32.totalorder %s722_s4, %s825_s0 }
  0x34   : > { %p496_p3 = pnand %p495_p0, %p494_p13  ;;  %p500_p9 = scmp.lt.u32.totalorder %s498_s9, %s493_s6 }
  0x35   : > { %p502_p1 = scmp.lt.u32.totalorder %s493_s6, %s722_s4 }
  0x36   : > { %p497_p5 = pneg %p496_p3  ;;  %p501_p2 = por %p500_p9, %p499_p7 }
  0x38   : > { %p503_p4 = por %p502_p1, %p501_p2 }
  0x3a   : > { %p504_p6 = pnand %p503_p4, %p497_p5 }
  0x3c   : > { %507 = shalt.err (!%p504_p6)
}
  0x3d   : > { %s508_s27 = scalar_lea.vmem %s728_s25, 128  ;;  %s598_s28 = smov [#allocation2]  }
  0x3e   : > { %p509_p8 = scmp.ne.s32.totalorder %s728_s25, %s508_s27  ;;  %s513_s29 = sshll.u32 %s598_s28, 4  ;;  %s514_s29 = int_to_ptr.vmem [resolvable:$false] %s513_s29 }
  0x3f   : > { %s515_s23 = scalar_lea.vmem %s514_s29, 256  ;;  %p516_p3 = scmp.lt.s32.totalorder %s728_s25, %s514_s29 }
  0x40   : > { %p511_p10 = pnand %p509_p8, %p495_p0  ;;  %p517_p7 = scmp.lt.s32.totalorder %s515_s23, %s508_s27 }
  0x42   : > { %p512_p13 = pneg %p511_p10  ;;  %p518_p9 = por %p517_p7, %p516_p3 }
  0x44   : > { %p519_p2 = pnand %p518_p9, %p512_p13 }
  0x46   : > { %522 = shalt.err (!%p519_p2)
}
  0x47   : > { %415 = dma.hbm_to_vmem [thread:$0]  (!%p724_p11), %s722_s4, 128, %s728_s25, %s149_s5  }
  0x48   : > { %p839_p5 = scmp.ne.s32.totalorder %s834_s20, 0 }
  0x49   : > { %s758_s30 = sand.u32 (!%p839_p5), 1, %s585_s13   ;;  %p840_p0 = scmp.ne.s32.totalorder (!%p839_p5), %s832_s18, 0 }
  0x4a   : > { %168 = sbr.rel (%p839_p5) target bundleno = 339 (0x153), region = 32  ;;  %s378_s22 = sshll.u32 (!%p839_p5), %s758_s30, 3 }
  0x4b   : > { %s171_s6 = scalar_lea.sflag (!%p839_p5), [#allocation3], %s758_s30  ;;  %s174_s7 = scalar_lea.vmem (!%p839_p5), [#allocation2], %s378_s22 }
  0x51   : > { %568 = dma.done.wait (%p840_p0), %s171_s6, 128  }
  0x52   : > { %570 = vsyncadd (%p840_p0), %s171_s6, 4294967168  ;;  %p841_p11 = scmp.eq.s32.totalorder %s643_s16, 0 }
  0x54   : > { %572 = dma.done.wait (%p841_p11), [#allocation6], 256   ;;  %p842_p1 = pmov %p841_p11 }
  0x55   : > { %v599_v0 = vmov 0.0   ;;  %vm600_vm0 = vmmov 0   ;;  %v461_v1 = vld [vmem:[#allocation5] sm:$0xff]   ;;  %v462_v2 = vld [vmem:[#allocation5 + $0x8] sm:$0xff]   ;;  %v202_v3 = vld [vmem:[%s174_s7] sm:$0xff]  ;;  %vm227_vm1 = vcmask 261120  }
  0x56   : > { %574 = vsyncadd (%p842_p1), [#allocation6], 4294967040  ;;  %392 = vmatprep.subr.bf16.mxu0 %v599_v0  ;;  %396 = vmatprep.mubr.msk.bf16.mxu0 %vm600_vm0, %v599_v0  ;;  %v203_v4 = vpack.c.bf16 %v202_v3, %v202_v3  ;;  %v381_v5 = vld [vmem:[%s827_s2] ss:$0 sm:$0xff]  ;;  %s386_s4 = sshll.u32 %s643_s16, 7  ;;  %s200_s25 = scalar_lea.vmem [#allocation7], %s378_s22 }
  0x57   : > { %393 = vmatpush3.bf16.msra.mxu0 %v461_v1  ;;  %s291_s26 = sshll.u32 %s200_s25, 4  ;;  %s781_s9 = scalar_lea.hbm %s828_s3, %s386_s4  ;;  %s783_s26 = int_to_ptr.vmem [resolvable:$true] %s291_s26 }
  0x58   : > { %394 = vmatprep.subr.bf16.mxu0 %v599_v0  ;;  %s278_s10 = scalar_lea.sflag [#allocation4], %s758_s30  ;;  %s523_s11 = scalar_lea.vmem %s783_s26, 128 }
  0x59   : > { %p524_p4 = scmp.ne.s32.totalorder %s783_s26, %s523_s11  ;;  %s601_s16 = smov [#allocation7]  }
  0x5a   : > { %s527_s27 = sshll.u32 %s601_s16, 4  ;;  %s528_s27 = int_to_ptr.vmem [resolvable:$false] %s527_s27 }
  0x5b   : > { %395 = vmatpush3.bf16.msra.mxu0 %v462_v2  ;;  %p525_p6 = pnand %p524_p4, %p713_p12  ;;  %s529_s28 = scalar_lea.vmem %s528_s27, 256 }
  0x5c   : > { %p530_p10 = scmp.lt.s32.totalorder %s783_s26, %s528_s27  ;;  %p531_p13 = scmp.lt.s32.totalorder %s529_s28, %s523_s11 }
  0x5d   : > { %p526_p8 = pneg %p525_p6 }
  0x5e   : > { %397 = vmatmul.mubr.msk.bf16.vlgmr.msra.gmra.mrb[0].mxu0 %vm227_vm1, %v203_v4  ;;  %p532_p3 = por %p531_p13, %p530_p10 }
  0x60   : > { %p533_p7 = pnand %p532_p3, %p526_p8 }
 0x131   : > { %v265_v6 = vpop.f32.mrb[0].mxu0 }
 0x132   : > { %v266_v7 = vadd.f32 %v381_v5, %v265_v6  ;;  %v398_v8 = vpop.f32.mrb[1].mxu0 }
 0x133   : > { %v268_v9 = vpop.f32.mrb[2].mxu0 }
 0x134   : > { %v272_v10 = vmul.f32 0.70710677, %v266_v7  ;;  %v399_v11 = vpop.f32.mrb[3].mxu0  ;;  %v271_v13 = vmul.f32 0.5, %v266_v7 }
 0x136   : > { %463 = verf.f32 %v272_v10 }
 0x140   : > { %v464_v12 = vpop.eup %463 }
 0x141   : > { %v274_v14 = vadd.f32 1.0, %v464_v12 }
 0x143   : > { %v275_v15 = vmul.f32 %v274_v14, %v271_v13 }
 0x145   : > { %276 = vst [vmem:[%s200_s25] sm:$0xff] %v275_v15 }
 0x146   : > { %536 = shalt.err (!%p533_p7)
}
 0x147   : > { %s537_s29 = scalar_lea.hbm %s781_s9, 128  ;;  %s541_s22 = scalar_lea.hbm %s828_s3, 256 }
 0x148   : > { %p538_p9 = scmp.ne.s32.totalorder %s781_s9, %s537_s29  ;;  %p542_p0 = scmp.lt.u32.totalorder %s781_s9, %s828_s3 }
 0x149   : > { %p543_p11 = scmp.lt.u32.totalorder %s541_s22, %s537_s29  ;;  %p545_p4 = scmp.lt.u32.totalorder %s537_s29, %s781_s9 }
 0x14a   : > { %p539_p2 = pnand %p538_p9, %p713_p12 }
 0x14b   : > { %p544_p1 = por %p543_p11, %p542_p0 }
 0x14c   : > { %p540_p5 = pneg %p539_p2 }
 0x14d   : > { %p546_p6 = por %p545_p4, %p544_p1 }
 0x14f   : > { %p547_p8 = pnand %p546_p6, %p540_p5 }
 0x151   : > { %550 = shalt.err (!%p547_p8)
}
 0x152   : > { %406 = dma.vmem_to_hbm [thread:$0]  (%p713_p12), %s783_s26, 128, %s781_s9, %s278_s10  }
 0x153 PF: > { %s303_s18 = sand.u32 1, %s581_s12   ;;  %p843_p10 = scmp.ne.s32.totalorder %s833_s19, 0 }
 0x154   : > { %p844_p13 = scmp.ge.s32.totalorder %s593_s15, 2  ;;  %s304_s20 = scalar_lea.sflag [#allocation4], %s303_s18 }
 0x156   : > { %p417_p3 = pnand %p844_p13, %p843_p10 }
 0x158   : > { %576 = dma.done.wait (!%p417_p3), %s304_s20, 128  }
 0x159   : > { %578 = vsyncadd (!%p417_p3), %s304_s20, 4294967168  ;;  %p17_p7 = scmp.ge.s32.totalorder %s678_s24, 4   ;;  %s845_s12 = smov %s585_s13 }
 0x15a   : > { %s846_s13 = smov %s589_s14  ;;  %s847_s14 = smov %s709_s17 }
 0x15b   : > { %s848_s15 = smov %s678_s24  ;;  %19 = sbr.rel (!%p17_p7) target bundleno = 6 (0x6), region = 81 }
 0x162   :  { %309 = vsyncpa [#allocation3], 1 }
 0x163   :  { %311 = vsyncpa [#allocation3 + $0x1], 1 }
 0x164   :  { %312 = vsyncpa [#allocation6], 1 }
 0x165   :  { %313 = vsyncpa [#allocation4], 1 }
 0x166   :  { %315 = vsyncpa [#allocation4 + $0x1], 1 }

// kernel: tpu_custom_call.1
= control target key start
LH: loop header
LB: loop body
LE: loop exit
PB: predicated region body
PF: predicated region fallthrough
CT: control target
= control target key end

     0   :  { %8 = vsyncpa [#allocation3], 0  ;;  %s825_s0 = inlined_call_operand.hbm [shape: f32[16,32], index: 0, kind: input, shape index: {}]   ;;  %s826_s1 = inlined_call_operand.hbm [shape: bf16[32,128], index: 1, kind: input, shape index: {}]   ;;  %s827_s2 = inlined_call_operand.vmem [shape: f32[1,128], index: 2, kind: input, shape index: {}]   ;;  %s828_s3 = inlined_call_operand.hbm [shape: f32[16,128], index: 3, kind: output, shape index: {}]  }
   0x1   :  { %10 = vsyncpa [#allocation3 + $0x1], 0 }
   0x2   :  { %11 = vsyncpa [#allocation6], 0 }
   0x3   :  { %12 = vsyncpa [#allocation4], 0 }
   0x4   :  { %14 = vsyncpa [#allocation4 + $0x1], 0  ;;  %s622_s12 = smov 0   ;;  %s624_s13 = smov 0  }
   0x5   :  { %s626_s14 = smov 0   ;;  %s628_s15 = smov 0  }
   0x6 LB: > { %s643_s16 = sadd.s32 4294967295, %s593_s15   ;;  %s371_s17 = sadd.s32 4294967294, %s593_s15   ;;  %s593_s15 = sphi %s628_s15, %s848_s15   ;;  %s589_s14 = sphi %s626_s14, %s847_s14   ;;  %s585_s13 = sphi %s624_s13, %s846_s13   ;;  %s581_s12 = sphi %s622_s12, %s845_s12  }
   0x7   : > { %p40_p0 = scmp.ne.s32.totalorder %s585_s13, %s581_s12  ;;  %p829_p1 = scmp.eq.s32.totalorder %s643_s16, 0 }
   0x8   : > { %p112_p3 = scmp.eq.s32.totalorder %s371_s17, 1  ;;  %p372_p5 = scmp.ge.s32.totalorder %s593_s15, 1 }
   0x9   : > { %p652_p4 = por %p829_p1, %p40_p0  ;;  %p119_p7 = scmp.lt.s32.totalorder %s593_s15, 3 }
   0xa   : > { %p657_p6 = por %p112_p3, %p40_p0  ;;  %s595_s21 = smov [#allocation5]  }
   0xb   : > { %s832_s18 = scalar_select %p652_p4, 1, 0 }
   0xc   : > { %s833_s19 = scalar_select %p657_p6, 1, 0 }
   0xd   : > { %p662_p8 = pnand %p372_p5, %p119_p7  ;;  %s131_s22 = sshll.u32 %s595_s21, 4  ;;  %s666_s22 = int_to_ptr.vmem [resolvable:$true] %s131_s22 }
   0xe   : > { %s678_s24 = sadd.s32 1, %s593_s15   ;;  %s27_s25 = sadd.s32 1, %s589_s14 }
   0xf   : > { %s834_s20 = scalar_select %p662_p8, 1, 0 }
  0x10   : > { %p408_p9 = pneg %p662_p8  ;;  %s24_s26 = ssub.s32 %s593_s15, %s678_s24 }
  0x11   : > { %s465_s29 = scalar_lea.hbm %s826_s1, 256 }
  0x12   : > { %p673_p11 = pnand %p408_p9, %p829_p1  ;;  %p466_p12 = scmp.ne.s32.totalorder %s826_s1, %s465_s29 }
  0x13   : > { %p472_p5 = scmp.lt.u32.totalorder %s465_s29, %s826_s1 }
  0x14   : > { %p467_p13 = pneg %p673_p11 }
  0x16   : > { %p468_p0 = pnand %p467_p13, %p466_p12 }
  0x18   : > { %p469_p3 = pneg %p468_p0 }
  0x1a   : > { %p474_p7 = pnand %p472_p5, %p469_p3 }
  0x1c   : > { %477 = shalt.err (!%p474_p7)
}
  0x1d   : > { %s478_s7 = scalar_lea.vmem %s666_s22, 256  ;;  %p486_p2 = scmp.lt.s32.totalorder %s666_s22, %s666_s22 }
  0x1e   : > { %p479_p9 = scmp.ne.s32.totalorder %s666_s22, %s478_s7  ;;  %p487_p6 = scmp.lt.s32.totalorder %s478_s7, %s478_s7 }
  0x20   : > { %p481_p10 = pnand %p479_p9, %p467_p13  ;;  %p488_p4 = por %p487_p6, %p486_p2 }
  0x22   : > { %p482_p1 = pneg %p481_p10 }
  0x24   : > { %p489_p8 = pnand %p488_p4, %p482_p1 }
  0x26   : > { %492 = shalt.err (!%p489_p8)
}
  0x27   : > { %s596_s8 = smov 64   ;;  %s597_s9 = smov 4  }
  0x28   : > { %411 = dma.hbm_to_vmem [thread:$0]  (!%p673_p11), %s826_s1, 256, %s666_s22, [#allocation6], %s596_s8, %s596_s8, %s597_s9  }
  0x29   : > { %p25_p2 = scmp.eq.s32.totalorder %s24_s26, 0  ;;  %p34_p1 = scmp.ne.s32.totalorder %s589_s14, %s585_s13 }
  0x2a   : > { %p35_p4 = scmp.eq.s32.totalorder %s593_s15, 0  ;;  %p421_p6 = scmp.lt.s32.totalorder %s593_s15, 2 }
  0x2b   : > { %s709_s17 = scalar_select %p25_p2, %s589_s14, %s27_s25  }
  0x2c   : > { %p36_p8 = por %p35_p4, %p34_p1  ;;  %p836_p10 = scmp.eq.s32.totalorder %s643_s16, 1 }
  0x2d   : > { %s148_s27 = sand.u32 1, %s589_s14   ;;  %s376_s28 = sshll.u32 %s593_s15, 7 }
  0x2e   : > { %p713_p12 = por %p836_p10, %p34_p1  ;;  %s375_s29 = sshll.u32 %s148_s27, 3 }
  0x2f   : > { %s722_s4 = scalar_lea.hbm %s825_s0, %s376_s28  ;;  %s152_s22 = scalar_lea.vmem [#allocation2], %s375_s29 }
  0x30   : > { %s159_s25 = sshll.u32 %s152_s22, 4  ;;  %p724_p11 = pnand %p421_p6, %p36_p8  ;;  %s728_s25 = int_to_ptr.vmem [resolvable:$true] %s159_s25 }
  0x31   : > { %s149_s5 = scalar_lea.sflag [#allocation3], %s148_s27  ;;  %s493_s6 = scalar_lea.hbm %s722_s4, 128 }
  0x32   : > { %p494_p13 = scmp.ne.s32.totalorder %s722_s4, %s493_s6  ;;  %p495_p0 = pneg %p724_p11 }
  0x33   : > { %s498_s9 = scalar_lea.hbm %s825_s0, 256  ;;  %p499_p7 = scmp.lt.u32.totalorder %s722_s4, %s825_s0 }
  0x34   : > { %p496_p3 = pnand %p495_p0, %p494_p13  ;;  %p500_p9 = scmp.lt.u32.totalorder %s498_s9, %s493_s6 }
  0x35   : > { %p502_p1 = scmp.lt.u32.totalorder %s493_s6, %s722_s4 }
  0x36   : > { %p497_p5 = pneg %p496_p3  ;;  %p501_p2 = por %p500_p9, %p499_p7 }
  0x38   : > { %p503_p4 = por %p502_p1, %p501_p2 }
  0x3a   : > { %p504_p6 = pnand %p503_p4, %p497_p5 }
  0x3c   : > { %507 = shalt.err (!%p504_p6)
}
  0x3d   : > { %s508_s27 = scalar_lea.vmem %s728_s25, 128  ;;  %s598_s28 = smov [#allocation2]  }
  0x3e   : > { %p509_p8 = scmp.ne.s32.totalorder %s728_s25, %s508_s27  ;;  %s513_s29 = sshll.u32 %s598_s28, 4  ;;  %s514_s29 = int_to_ptr.vmem [resolvable:$false] %s513_s29 }
  0x3f   : > { %s515_s23 = scalar_lea.vmem %s514_s29, 256  ;;  %p516_p3 = scmp.lt.s32.totalorder %s728_s25, %s514_s29 }
  0x40   : > { %p511_p10 = pnand %p509_p8, %p495_p0  ;;  %p517_p7 = scmp.lt.s32.totalorder %s515_s23, %s508_s27 }
  0x42   : > { %p512_p13 = pneg %p511_p10  ;;  %p518_p9 = por %p517_p7, %p516_p3 }
  0x44   : > { %p519_p2 = pnand %p518_p9, %p512_p13 }
  0x46   : > { %522 = shalt.err (!%p519_p2)
}
  0x47   : > { %415 = dma.hbm_to_vmem [thread:$0]  (!%p724_p11), %s722_s4, 128, %s728_s25, %s149_s5  }
  0x48   : > { %p839_p5 = scmp.ne.s32.totalorder %s834_s20, 0 }
  0x49   : > { %s758_s30 = sand.u32 (!%p839_p5), 1, %s585_s13   ;;  %p840_p0 = scmp.ne.s32.totalorder (!%p839_p5), %s832_s18, 0 }
  0x4a   : > { %168 = sbr.rel (%p839_p5) target bundleno = 339 (0x153), region = 32  ;;  %s378_s22 = sshll.u32 (!%p839_p5), %s758_s30, 3 }
  0x4b   : > { %s171_s6 = scalar_lea.sflag (!%p839_p5), [#allocation3], %s758_s30  ;;  %s174_s7 = scalar_lea.vmem (!%p839_p5), [#allocation2], %s378_s22 }
  0x51   : > { %568 = dma.done.wait (%p840_p0), %s171_s6, 128  }
  0x52   : > { %570 = vsyncadd (%p840_p0), %s171_s6, 4294967168  ;;  %p841_p11 = scmp.eq.s32.totalorder %s643_s16, 0 }
  0x54   : > { %572 = dma.done.wait (%p841_p11), [#allocation6], 256   ;;  %p842_p1 = pmov %p841_p11 }
  0x55   : > { %v599_v0 = vmov 0.0   ;;  %vm600_vm0 = vmmov 0   ;;  %v461_v1 = vld [vmem:[#allocation5] sm:$0xff]   ;;  %v462_v2 = vld [vmem:[#allocation5 + $0x8] sm:$0xff]   ;;  %v202_v3 = vld [vmem:[%s174_s7] sm:$0xff]  ;;  %vm227_vm1 = vcmask 261120  }
  0x56   : > { %574 = vsyncadd (%p842_p1), [#allocation6], 4294967040  ;;  %392 = vmatprep.subr.bf16.mxu0 %v599_v0  ;;  %396 = vmatprep.mubr.msk.bf16.mxu0 %vm600_vm0, %v599_v0  ;;  %v203_v4 = vpack.c.bf16 %v202_v3, %v202_v3  ;;  %v381_v5 = vld [vmem:[%s827_s2] ss:$0 sm:$0xff]  ;;  %s386_s4 = sshll.u32 %s643_s16, 7  ;;  %s200_s25 = scalar_lea.vmem [#allocation7], %s378_s22 }
  0x57   : > { %393 = vmatpush3.bf16.msra.mxu0 %v461_v1  ;;  %s291_s26 = sshll.u32 %s200_s25, 4  ;;  %s781_s9 = scalar_lea.hbm %s828_s3, %s386_s4  ;;  %s783_s26 = int_to_ptr.vmem [resolvable:$true] %s291_s26 }
  0x58   : > { %394 = vmatprep.subr.bf16.mxu0 %v599_v0  ;;  %s278_s10 = scalar_lea.sflag [#allocation4], %s758_s30  ;;  %s523_s11 = scalar_lea.vmem %s783_s26, 128 }
  0x59   : > { %p524_p4 = scmp.ne.s32.totalorder %s783_s26, %s523_s11  ;;  %s601_s16 = smov [#allocation7]  }
  0x5a   : > { %s527_s27 = sshll.u32 %s601_s16, 4  ;;  %s528_s27 = int_to_ptr.vmem [resolvable:$false] %s527_s27 }
  0x5b   : > { %395 = vmatpush3.bf16.msra.mxu0 %v462_v2  ;;  %p525_p6 = pnand %p524_p4, %p713_p12  ;;  %s529_s28 = scalar_lea.vmem %s528_s27, 256 }
  0x5c   : > { %p530_p10 = scmp.lt.s32.totalorder %s783_s26, %s528_s27  ;;  %p531_p13 = scmp.lt.s32.totalorder %s529_s28, %s523_s11 }
  0x5d   : > { %p526_p8 = pneg %p525_p6 }
  0x5e   : > { %397 = vmatmul.mubr.msk.bf16.vlgmr.msra.gmra.mrb[0].mxu0 %vm227_vm1, %v203_v4  ;;  %p532_p3 = por %p531_p13, %p530_p10 }
  0x60   : > { %p533_p7 = pnand %p532_p3, %p526_p8 }
 0x131   : > { %v265_v6 = vpop.f32.mrb[0].mxu0 }
 0x132   : > { %v266_v7 = vadd.f32 %v381_v5, %v265_v6  ;;  %v398_v8 = vpop.f32.mrb[1].mxu0 }
 0x133   : > { %v268_v9 = vpop.f32.mrb[2].mxu0 }
 0x134   : > { %v272_v10 = vmul.f32 0.70710677, %v266_v7  ;;  %v399_v11 = vpop.f32.mrb[3].mxu0  ;;  %v271_v13 = vmul.f32 0.5, %v266_v7 }
 0x136   : > { %463 = verf.f32 %v272_v10 }
 0x140   : > { %v464_v12 = vpop.eup %463 }
 0x141   : > { %v274_v14 = vadd.f32 1.0, %v464_v12 }
 0x143   : > { %v275_v15 = vmul.f32 %v274_v14, %v271_v13 }
 0x145   : > { %276 = vst [vmem:[%s200_s25] sm:$0xff] %v275_v15 }
 0x146   : > { %536 = shalt.err (!%p533_p7)
}
 0x147   : > { %s537_s29 = scalar_lea.hbm %s781_s9, 128  ;;  %s541_s22 = scalar_lea.hbm %s828_s3, 256 }
 0x148   : > { %p538_p9 = scmp.ne.s32.totalorder %s781_s9, %s537_s29  ;;  %p542_p0 = scmp.lt.u32.totalorder %s781_s9, %s828_s3 }
 0x149   : > { %p543_p11 = scmp.lt.u32.totalorder %s541_s22, %s537_s29  ;;  %p545_p4 = scmp.lt.u32.totalorder %s537_s29, %s781_s9 }
 0x14a   : > { %p539_p2 = pnand %p538_p9, %p713_p12 }
 0x14b   : > { %p544_p1 = por %p543_p11, %p542_p0 }
 0x14c   : > { %p540_p5 = pneg %p539_p2 }
 0x14d   : > { %p546_p6 = por %p545_p4, %p544_p1 }
 0x14f   : > { %p547_p8 = pnand %p546_p6, %p540_p5 }
 0x151   : > { %550 = shalt.err (!%p547_p8)
}
 0x152   : > { %406 = dma.vmem_to_hbm [thread:$0]  (%p713_p12), %s783_s26, 128, %s781_s9, %s278_s10  }
 0x153 PF: > { %s303_s18 = sand.u32 1, %s581_s12   ;;  %p843_p10 = scmp.ne.s32.totalorder %s833_s19, 0 }
 0x154   : > { %p844_p13 = scmp.ge.s32.totalorder %s593_s15, 2  ;;  %s304_s20 = scalar_lea.sflag [#allocation4], %s303_s18 }
 0x156   : > { %p417_p3 = pnand %p844_p13, %p843_p10 }
 0x158   : > { %576 = dma.done.wait (!%p417_p3), %s304_s20, 128  }
 0x159   : > { %578 = vsyncadd (!%p417_p3), %s304_s20, 4294967168  ;;  %p17_p7 = scmp.ge.s32.totalorder %s678_s24, 4   ;;  %s845_s12 = smov %s585_s13 }
 0x15a   : > { %s846_s13 = smov %s589_s14  ;;  %s847_s14 = smov %s709_s17 }
 0x15b   : > { %s848_s15 = smov %s678_s24  ;;  %19 = sbr.rel (!%p17_p7) target bundleno = 6 (0x6), region = 81 }
 0x162   :  { %309 = vsyncpa [#allocation3], 1 }
 0x163   :  { %311 = vsyncpa [#allocation3 + $0x1], 1 }
 0x164   :  { %312 = vsyncpa [#allocation6], 1 }
 0x165   :  { %313 = vsyncpa [#allocation4], 1 }
 0x166   :  { %315 = vsyncpa [#allocation4 + $0x1], 1 }

</bundles_post_ra>
